<compile_context>
chip_gen: v7x
topology: tpu7x:2x2x1
jax: 0.10.0
libtpu: 0.0.40
codegen_flags: <defaults>
</compile_context>

<pallas_src>
import functools

import jax
import jax.numpy as jnp
from jax.experimental import pallas as pl
from jax.experimental.pallas import tpu as pltpu  # noqa: F401  (TPU backend)


def _build_pe_kernel(vpe_ref, out_ref, *, h, w, resolution):
    # vpe_ref: VMEM (resolution**2 + 1, D)  -- full positional-embedding table
    # out_ref: VMEM (h*w + 1, D)            -- gathered rows (result)
    #
    # Row 0: cls-token embedding.
    out_ref[0:1, :] = vpe_ref[0:1, :]
    # Rows 1..: for each feature-map row i, the w gathered table rows are
    # consecutive:  vpe[1 + i*resolution : 1 + i*resolution + w]
    #            -> out[1 + i*w        : 1 + (i+1)*w]
    # All starts/lengths are Python ints -> static slices, wide vld/vst.
    for i in range(h):
        out_ref[pl.ds(1 + i * w, w), :] = vpe_ref[pl.ds(1 + i * resolution, w), :]


def vpe_forward_pre_hook(vpe, x):
    """Returns the new positional embedding the hook would assign.

    vpe : (resolution**2 + 1, D) embedding table.
    x   : (N, C, h, w) NCHW feature map; only its spatial dims are consumed.
    out : (h*w + 1, D); row 0 = cls row, rows 1.. = top-left h x w block of
          the resolution x resolution grid, row-major.
    """
    n_src, d = vpe.shape
    resolution = round((n_src - 1) ** 0.5)
    assert resolution ** 2 + 1 == n_src
    _, _, h, w = x.shape
    assert h <= resolution and w <= resolution
    n_out = h * w + 1

    kernel = functools.partial(
        _build_pe_kernel, h=h, w=w, resolution=resolution
    )

    # Whole table + whole output resident in VMEM (tiny arrays; full-extent
    # blocks are exempt from the (8,128) rule).
    return pl.pallas_call(
        kernel,
        out_shape=jax.ShapeDtypeStruct((n_out, d), vpe.dtype),
        grid=(1,),
        in_specs=[pl.BlockSpec((n_src, d), lambda i: (0, 0))],
        out_specs=pl.BlockSpec((n_out, d), lambda i: (0, 0)),
    )(vpe)


if __name__ == "__main__":
    key = jax.random.PRNGKey(0)
    k_vpe, k_x = jax.random.split(key)

    resolution = 7          # CLIP RN50-style attention-pool grid
    dim = 64
    vpe = jax.random.normal(
        k_vpe, (resolution ** 2 + 1, dim), dtype=jnp.float32
    )

    # feature map input_[0]: NCHW, smaller than the stored resolution
    x = jax.random.normal(k_x, (2, 4, 5, 6), dtype=jnp.float32)

    out = vpe_forward_pre_hook(vpe, x)
    out = jax.block_until_ready(out)

    # pure-JAX reference of the hook semantics
    _, _, h, w = x.shape
    vpi = jnp.arange(resolution ** 2, dtype=jnp.int32).reshape(
        resolution, resolution
    )
    vpi = vpi[:h, :w].reshape(-1)
    idx = jnp.concatenate([jnp.zeros((1,), jnp.int32), vpi + 1])
    ref = vpe[idx]

    assert out.shape == (h * w + 1, dim)
    assert out.dtype == vpe.dtype
    assert jnp.allclose(out, ref), "mismatch vs reference gather"

    print("KERNEL_OK")
</pallas_src>

<mosaic_0001>
module attributes {stable_mosaic.version = 11 : i64} {
  func.func @_build_pe_kernel(%arg0: i32, %arg1: memref<50x64xf32, #tpu.memory_space<vmem>>, %arg2: memref<31x64xf32, #tpu.memory_space<vmem>>) attributes {dimension_semantics = [#tpu.dimension_semantics<arbitrary>], iteration_bounds = array<i64: 1>, scalar_prefetch = 0 : i64, scratch_operands = 0 : i64, tpu.core_type = #tpu.core_type<tc>, window_params = [{pipeline_mode = #tpu.pipeline_mode<synchronous>, transform_indices = @transform_0, window_bounds = array<i64: 50, 64>}, {pipeline_mode = #tpu.pipeline_mode<synchronous>, transform_indices = @transform_1, window_bounds = array<i64: 31, 64>}]} {
    %c0 = arith.constant 0 : index
    %c0_0 = arith.constant 0 : index
    %0 = vector.load %arg1[%c0, %c0_0] : memref<50x64xf32, #tpu.memory_space<vmem>>, vector<1x64xf32>
    %c0_1 = arith.constant 0 : index
    %c0_2 = arith.constant 0 : index
    %1 = vector.load %arg2[%c0_1, %c0_2] : memref<31x64xf32, #tpu.memory_space<vmem>>, vector<1x64xf32>
    tpu.vector_store %arg2[%c0_1, %c0_2], %0 {strides = array<i32>} : memref<31x64xf32, #tpu.memory_space<vmem>>, vector<1x64xf32>,
    %c1 = arith.constant 1 : index
    %c0_3 = arith.constant 0 : index
    %2 = vector.load %arg1[%c1, %c0_3] : memref<50x64xf32, #tpu.memory_space<vmem>>, vector<6x64xf32>
    %c1_4 = arith.constant 1 : index
    %c0_5 = arith.constant 0 : index
    %3 = vector.load %arg2[%c1_4, %c0_5] : memref<31x64xf32, #tpu.memory_space<vmem>>, vector<6x64xf32>
    tpu.vector_store %arg2[%c1_4, %c0_5], %2 {strides = array<i32>} : memref<31x64xf32, #tpu.memory_space<vmem>>, vector<6x64xf32>,
    %c8 = arith.constant 8 : index
    %c0_6 = arith.constant 0 : index
    %4 = vector.load %arg1[%c8, %c0_6] : memref<50x64xf32, #tpu.memory_space<vmem>>, vector<6x64xf32>
    %c7 = arith.constant 7 : index
    %c0_7 = arith.constant 0 : index
    %5 = vector.load %arg2[%c7, %c0_7] : memref<31x64xf32, #tpu.memory_space<vmem>>, vector<6x64xf32>
    tpu.vector_store %arg2[%c7, %c0_7], %4 {strides = array<i32>} : memref<31x64xf32, #tpu.memory_space<vmem>>, vector<6x64xf32>,
    %c15 = arith.constant 15 : index
    %c0_8 = arith.constant 0 : index
    %6 = vector.load %arg1[%c15, %c0_8] : memref<50x64xf32, #tpu.memory_space<vmem>>, vector<6x64xf32>
    %c13 = arith.constant 13 : index
    %c0_9 = arith.constant 0 : index
    %7 = vector.load %arg2[%c13, %c0_9] : memref<31x64xf32, #tpu.memory_space<vmem>>, vector<6x64xf32>
    tpu.vector_store %arg2[%c13, %c0_9], %6 {strides = array<i32>} : memref<31x64xf32, #tpu.memory_space<vmem>>, vector<6x64xf32>,
    %c22 = arith.constant 22 : index
    %c0_10 = arith.constant 0 : index
    %8 = vector.load %arg1[%c22, %c0_10] : memref<50x64xf32, #tpu.memory_space<vmem>>, vector<6x64xf32>
    %c19 = arith.constant 19 : index
    %c0_11 = arith.constant 0 : index
    %9 = vector.load %arg2[%c19, %c0_11] : memref<31x64xf32, #tpu.memory_space<vmem>>, vector<6x64xf32>
    tpu.vector_store %arg2[%c19, %c0_11], %8 {strides = array<i32>} : memref<31x64xf32, #tpu.memory_space<vmem>>, vector<6x64xf32>,
    %c29 = arith.constant 29 : index
    %c0_12 = arith.constant 0 : index
    %10 = vector.load %arg1[%c29, %c0_12] : memref<50x64xf32, #tpu.memory_space<vmem>>, vector<6x64xf32>
    %c25 = arith.constant 25 : index
    %c0_13 = arith.constant 0 : index
    %11 = vector.load %arg2[%c25, %c0_13] : memref<31x64xf32, #tpu.memory_space<vmem>>, vector<6x64xf32>
    tpu.vector_store %arg2[%c25, %c0_13], %10 {strides = array<i32>} : memref<31x64xf32, #tpu.memory_space<vmem>>, vector<6x64xf32>,
    return
  }
  func.func @transform_0(%arg0: i32) -> (i32, i32) {
    %c0_i32 = arith.constant 0 : i32
    %c0_i32_0 = arith.constant 0 : i32
    %c0_i32_1 = arith.constant 0 : i32
    return %c0_i32, %c0_i32_0 : i32, i32
  }
  func.func @transform_1(%arg0: i32) -> (i32, i32) {
    %c0_i32 = arith.constant 0 : i32
    %c0_i32_0 = arith.constant 0 : i32
    %c0_i32_1 = arith.constant 0 : i32
    return %c0_i32, %c0_i32_0 : i32, i32
  }
}

</mosaic_0001>

<bundles_post_ra>
// kernel: tpu_custom_call.1
= control target key start
LH: loop header
LB: loop body
LE: loop exit
PB: predicated region body
PF: predicated region fallthrough
CT: control target
= control target key end

     0   :  { %6 = vsyncpa [#allocation3], 0  ;;  %s150_s0 = inlined_call_operand.hbm [shape: f32[50,64], index: 0, kind: input, shape index: {}]   ;;  %s151_s1 = inlined_call_operand.hbm [shape: f32[31,64], index: 1, kind: output, shape index: {}]  }
   0x1   :  { %7 = vsyncpa [#allocation4], 0  ;;  %s106_s6 = smov [#allocation2]   ;;  %s58_s10 = scalar_lea.hbm %s150_s0, 896 }
   0x2   :  { %s13_s7 = sshll.u32 %s106_s6, 4  ;;  %p59_p0 = scmp.ne.s32.totalorder %s150_s0, %s58_s10  ;;  %s14_s7 = int_to_ptr.vmem [resolvable:$true] %s13_s7 }
   0x3   :  { %p62_p1 = scmp.lt.u32.totalorder %s58_s10, %s150_s0 }
   0x5   :  { %p64_p2 = pnand %p62_p1, %p59_p0 }
   0x7   :  { %67 = shalt.err (!%p64_p2)
}
   0x8   :  { %s68_s15 = scalar_lea.vmem %s14_s7, 896  ;;  %p73_p4 = scmp.lt.s32.totalorder %s14_s7, %s14_s7 }
   0x9   :  { %p69_p3 = scmp.ne.s32.totalorder %s14_s7, %s68_s15  ;;  %p74_p5 = scmp.lt.s32.totalorder %s68_s15, %s68_s15 }
   0xb   :  { %p75_p6 = por %p74_p5, %p73_p4 }
   0xd   :  { %p76_p7 = pnand %p75_p6, %p69_p3 }
   0xf   :  { %79 = shalt.err (!%p76_p7)
}
  0x10   :  { %s107_s16 = smov 128   ;;  %s108_s17 = smov 8  }
  0x11   :  { %19 = dma.hbm_to_vmem [thread:$0]  %s150_s0, 896, %s14_s7, [#allocation3], %s107_s16, %s107_s16, %s108_s17  }
  0x12   :  { %102 = dma.done.wait [#allocation3], 896  }
  0x13   :  { %103 = vsyncadd [#allocation3], 4294966400  ;;  %s109_s20 = smov [#allocation5]   ;;  %vm24_vm0 = vcmask 516096   ;;  %vm27_vm1 = vcmask 521216  }
  0x14   :  { %s42_s21 = sshll.u32 %s109_s20, 4  ;;  %v23_v0 = vld [vmem:[#allocation2] sm:$0x1]  ;;  %v26_v1 = vld [vmem:[#allocation2 + $0x1] sm:$0x3f]  ;;  %s43_s21 = int_to_ptr.vmem [resolvable:$true] %s42_s21 }
  0x15   :  { %v29_v2 = vld [vmem:[#allocation2 + $0x8] sm:$0x3f]  ;;  %25 = vst.msk [vmem:[#allocation5] sm:$0x1] %vm24_vm0, %v23_v0  ;;  %v31_v3 = vld [vmem:[#allocation2 + $0xf] sm:$0x3f]  ;;  %p85_p9 = scmp.lt.s32.totalorder %s43_s21, %s43_s21 }
  0x16   :  { %28 = vst.msk [vmem:[#allocation5 + $0x1] sm:$0x3f] %vm27_vm1, %v26_v1  ;;  %30 = vst.msk [vmem:[#allocation5 + $0x7] sm:$0x3f] %vm27_vm1, %v29_v2  ;;  %v33_v4 = vld [vmem:[#allocation2 + $0x16] sm:$0x3f] }
  0x17   :  { %v35_v5 = vld [vmem:[#allocation2 + $0x1d] sm:$0x3f]  ;;  %32 = vst.msk [vmem:[#allocation5 + $0xd] sm:$0x3f] %vm27_vm1, %v31_v3  ;;  %34 = vst.msk [vmem:[#allocation5 + $0x13] sm:$0x3f] %vm27_vm1, %v33_v4 }
  0x18   :  { %36 = vst.msk [vmem:[#allocation5 + $0x19] sm:$0x3f] %vm27_vm1, %v35_v5  ;;  %s80_s0 = scalar_lea.vmem %s43_s21, 512 }
  0x19   :  { %p81_p8 = scmp.ne.s32.totalorder %s43_s21, %s80_s0  ;;  %p86_p10 = scmp.lt.s32.totalorder %s80_s0, %s80_s0 }
  0x1b   :  { %p87_p11 = por %p86_p10, %p85_p9 }
  0x1d   :  { %p88_p12 = pnand %p87_p11, %p81_p8 }
  0x1f   :  { %91 = shalt.err (!%p88_p12)
}
  0x20   :  { %s92_s24 = scalar_lea.hbm %s151_s1, 512 }
  0x21   :  { %p93_p13 = scmp.ne.s32.totalorder %s151_s1, %s92_s24  ;;  %p96_p0 = scmp.lt.u32.totalorder %s92_s24, %s151_s1 }
  0x23   :  { %p98_p1 = pnand %p96_p0, %p93_p13 }
  0x25   :  { %101 = shalt.err (!%p98_p1)
}
  0x26   :  { %48 = dma.vmem_to_hbm [thread:$0]  %s43_s21, 512, %s151_s1, [#allocation4], %s107_s16, %s107_s16, %s108_s17  }
  0x27   :  { %104 = dma.done.wait [#allocation4], 512  }
  0x28   :  { %105 = vsyncadd [#allocation4], 4294966784 }
  0x29   :  { %52 = vsyncpa [#allocation3], 1 }
  0x2a   :  { %53 = vsyncpa [#allocation4], 1 }

</bundles_post_ra>
